<compile_context>
chip_gen: v7x
topology: tpu7x:2x2x1
jax: 0.10.0
libtpu: 0.0.40
codegen_flags: <defaults>
</compile_context>

<pallas_src>
import functools

import jax
import jax.numpy as jnp
from jax.experimental import pallas as pl
from jax.experimental.pallas import tpu as pltpu


def actor_critic_kernel(x_ref, p1_ref, p2_ref, out_ref):
    """One fused forward step for a batch tile.

    x_ref  : [TB, IN]            state tile
    p1_ref : [IN_pad + 1, 2H]    fused layer-1 weights; last row = fused bias
    p2_ref : [2H_pad + 1, OUTP]  block-diag layer-2 weights (lane-padded);
                                 last row = fused bias
    out_ref: [TB, OUTP]          [action | value | zero-padding]
    """
    in_dim = x_ref.shape[1]
    h2 = p1_ref.shape[1]  # 2 * hidden

    x = x_ref[...]

    # ---- fused layer 1: [x @ (w1a | w1c)] + (b1a | b1c) ----
    w1 = p1_ref[:in_dim, :]
    b1 = p1_ref[p1_ref.shape[0] - 1:, :]
    h = jnp.dot(x, w1, preferred_element_type=jnp.float32) + b1

    # TODO(synk): nn.Dropout implemented as identity (eval-mode semantics);
    # training-mode stochastic masking would need pltpu.prng_* in-kernel.
    h = jnp.maximum(h, 0.0)

    # ---- fused layer 2: h @ blockdiag(w2a, w2c) + (b2a | b2c), lane-padded ----
    w2 = p2_ref[:h2, :]
    b2 = p2_ref[p2_ref.shape[0] - 1:, :]
    out = jnp.dot(h, w2, preferred_element_type=jnp.float32) + b2
    out_ref[...] = out.astype(out_ref.dtype)


def _round_up(x, m):
    return ((x + m - 1) // m) * m


def pack_params(params):
    """Pack 8 weight/bias arrays into two VMEM-friendly buffers.

    P1: [round_up(IN, 8) + 1, 2H]   rows 0..IN-1 = (w1a | w1c), last row = bias
    P2: [2H + 1, OUT_PAD]           block-diag (w2a, w2c) lane-padded to 128,
                                    last row = (b2a | b2c | 0...)
    """
    in_dim, hidden = params["w1a"].shape
    out_dim = params["w2a"].shape[1]
    h2 = 2 * hidden
    out_pad = max(128, _round_up(out_dim + 1, 128))

    # ---- P1 ----
    w1f = jnp.concatenate([params["w1a"], params["w1c"]], axis=1)      # [IN, 2H]
    b1f = jnp.concatenate([params["b1a"], params["b1c"]], axis=1)      # [1, 2H]
    in_pad = _round_up(in_dim, 8)
    if in_pad != in_dim:  # keep the bias row sublane-aligned
        w1f = jnp.concatenate(
            [w1f, jnp.zeros((in_pad - in_dim, h2), jnp.float32)], axis=0)
    p1 = jnp.concatenate([w1f, b1f], axis=0)                           # [IN_pad+1, 2H]

    # ---- P2 (block diagonal, lane padded) ----
    w2f = jnp.zeros((h2, out_pad), jnp.float32)
    w2f = w2f.at[:hidden, :out_dim].set(params["w2a"])
    w2f = w2f.at[hidden:, out_dim:out_dim + 1].set(params["w2c"])
    b2f = jnp.zeros((1, out_pad), jnp.float32)
    b2f = b2f.at[:, :out_dim].set(params["b2a"])
    b2f = b2f.at[:, out_dim:out_dim + 1].set(params["b2c"])
    p2 = jnp.concatenate([w2f, b2f], axis=0)                           # [2H+1, OUT_PAD]

    return p1, p2


@functools.partial(jax.jit, static_argnames=("out_dim", "block_b"))
def _actor_critic_call(state, p1, p2, *, out_dim, block_b=512):
    B, in_dim = state.shape
    h2 = p1.shape[1]
    out_pad = p2.shape[1]
    tb = min(block_b, B)
    grid = (pl.cdiv(B, tb),)

    flops = 2 * B * (in_dim * h2 + h2 * out_pad)
    bytes_accessed = 4 * (state.size + p1.size + p2.size + B * out_pad)

    fused = pl.pallas_call(
        actor_critic_kernel,
        out_shape=jax.ShapeDtypeStruct((B, out_pad), jnp.float32),
        grid_spec=pltpu.PrefetchScalarGridSpec(
            num_scalar_prefetch=0,
            grid=grid,
            in_specs=[
                pl.BlockSpec((tb, in_dim), lambda i: (i, 0)),   # batch-tiled x
                pl.BlockSpec(p1.shape, lambda i: (0, 0)),       # resident weights
                pl.BlockSpec(p2.shape, lambda i: (0, 0)),       # resident weights
            ],
            out_specs=pl.BlockSpec((tb, out_pad), lambda i: (i, 0)),
        ),
        compiler_params=pltpu.CompilerParams(
            dimension_semantics=("parallel",)),
        cost_estimate=pl.CostEstimate(
            flops=flops, transcendentals=0, bytes_accessed=bytes_accessed),
    )(state, p1, p2)

    action_pred = fused[:, :out_dim]
    value_pred = fused[:, out_dim:out_dim + 1]
    return action_pred, value_pred


def actor_critic_forward(state, params, *, block_b=512):
    """ActorCritic.forward: returns (action_pred [B, OUT], value_pred [B, 1])."""
    out_dim = params["w2a"].shape[1]
    p1, p2 = pack_params(params)  # in real use, pack once and reuse
    return _actor_critic_call(state, p1, p2, out_dim=out_dim, block_b=block_b)


def xavier_normal(key, fan_in, fan_out):
    # torch.nn.init.xavier_normal_ with gain=1: std = sqrt(2 / (fan_in + fan_out))
    std = (2.0 / (fan_in + fan_out)) ** 0.5
    # Stored as [in, out] (transposed vs PyTorch layout) for x @ W.
    return std * jax.random.normal(key, (fan_in, fan_out), dtype=jnp.float32)


def init_actor_critic_params(key, input_dim, hidden_dim, output_dim):
    k1, k2, k3, k4 = jax.random.split(key, 4)
    return {
        # actor MLP
        "w1a": xavier_normal(k1, input_dim, hidden_dim),
        "b1a": jnp.zeros((1, hidden_dim), jnp.float32),
        "w2a": xavier_normal(k2, hidden_dim, output_dim),
        "b2a": jnp.zeros((1, output_dim), jnp.float32),
        # critic MLP (output dim = 1)
        "w1c": xavier_normal(k3, input_dim, hidden_dim),
        "b1c": jnp.zeros((1, hidden_dim), jnp.float32),
        "w2c": xavier_normal(k4, hidden_dim, 1),
        "b2c": jnp.zeros((1, 1), jnp.float32),
    }


def reference_forward(state, p):
    h_a = jnp.maximum(state @ p["w1a"] + p["b1a"], 0.0)
    action = h_a @ p["w2a"] + p["b2a"]
    h_c = jnp.maximum(state @ p["w1c"] + p["b1c"], 0.0)
    value = h_c @ p["w2c"] + p["b2c"]
    return action, value


if __name__ == "__main__":
    INPUT_DIM, HIDDEN_DIM, OUTPUT_DIM = 8, 32, 4
    BATCH = 8

    key = jax.random.PRNGKey(0)
    k_state, k_params = jax.random.split(key)
    state = jax.random.normal(k_state, (BATCH, INPUT_DIM), dtype=jnp.float32)
    params = init_actor_critic_params(k_params, INPUT_DIM, HIDDEN_DIM, OUTPUT_DIM)

    action_pred, value_pred = actor_critic_forward(state, params)
    jax.block_until_ready((action_pred, value_pred))

    # sanity check against pure-JAX reference
    ref_action, ref_value = reference_forward(state, params)
    assert action_pred.shape == (BATCH, OUTPUT_DIM)
    assert value_pred.shape == (BATCH, 1)
    assert jnp.allclose(action_pred, ref_action, atol=1e-5, rtol=1e-5)
    assert jnp.allclose(value_pred, ref_value, atol=1e-5, rtol=1e-5)

    print("KERNEL_OK")
</pallas_src>

<mosaic_0001>
module attributes {stable_mosaic.version = 11 : i64} {
  func.func @actor_critic_kernel(%arg0: i32, %arg1: memref<8x8xf32, #tpu.memory_space<vmem>>, %arg2: memref<9x64xf32, #tpu.memory_space<vmem>>, %arg3: memref<65x128xf32, #tpu.memory_space<vmem>>, %arg4: memref<8x128xf32, #tpu.memory_space<vmem>>) attributes {dimension_semantics = [#tpu.dimension_semantics<parallel>], iteration_bounds = array<i64: 1>, scalar_prefetch = 0 : i64, scratch_operands = 0 : i64, tpu.core_type = #tpu.core_type<tc>, window_params = [{transform_indices = @transform_0, window_bounds = array<i64: 8, 8>}, {pipeline_mode = #tpu.pipeline_mode<synchronous>, transform_indices = @transform_1, window_bounds = array<i64: 9, 64>}, {pipeline_mode = #tpu.pipeline_mode<synchronous>, transform_indices = @transform_2, window_bounds = array<i64: 65, 128>}, {transform_indices = @transform_3, window_bounds = array<i64: 8, 128>}]} {
    %c0 = arith.constant 0 : index
    %c0_0 = arith.constant 0 : index
    %0 = vector.load %arg1[%c0, %c0_0] : memref<8x8xf32, #tpu.memory_space<vmem>>, vector<8x8xf32>
    %c0_1 = arith.constant 0 : index
    %c0_2 = arith.constant 0 : index
    %1 = vector.load %arg2[%c0_1, %c0_2] : memref<9x64xf32, #tpu.memory_space<vmem>>, vector<8x64xf32>
    %c8 = arith.constant 8 : index
    %c0_3 = arith.constant 0 : index
    %2 = vector.load %arg2[%c8, %c0_3] : memref<9x64xf32, #tpu.memory_space<vmem>>, vector<1x64xf32>
    %cst = arith.constant dense<0.000000e+00> : vector<8x64xf32>
    %3 = tpu.matmul %0, %1, %cst {dimension_numbers = #tpu.dot_dimension_numbers<[1], [0], [0], [1], [0, 0, 1, 1], [], []>} : vector<8x8xf32>, vector<8x64xf32>, vector<8x64xf32> -> vector<8x64xf32>
    %4 = vector.broadcast %2 : vector<1x64xf32> to vector<8x64xf32>
    %5 = arith.addf %3, %4 : vector<8x64xf32>
    %cst_4 = arith.constant 0.000000e+00 : f32
    %6 = vector.broadcast %cst_4 : f32 to vector<8x64xf32>
    %7 = arith.maximumf %5, %6 : vector<8x64xf32>
    %c0_5 = arith.constant 0 : index
    %c0_6 = arith.constant 0 : index
    %8 = vector.load %arg3[%c0_5, %c0_6] : memref<65x128xf32, #tpu.memory_space<vmem>>, vector<64x128xf32>
    %c64 = arith.constant 64 : index
    %c0_7 = arith.constant 0 : index
    %9 = vector.load %arg3[%c64, %c0_7] : memref<65x128xf32, #tpu.memory_space<vmem>>, vector<1x128xf32>
    %cst_8 = arith.constant dense<0.000000e+00> : vector<8x128xf32>
    %10 = tpu.matmul %7, %8, %cst_8 {dimension_numbers = #tpu.dot_dimension_numbers<[1], [0], [0], [1], [0, 0, 1, 1], [], []>} : vector<8x64xf32>, vector<64x128xf32>, vector<8x128xf32> -> vector<8x128xf32>
    %11 = vector.broadcast %9 : vector<1x128xf32> to vector<8x128xf32>
    %12 = arith.addf %10, %11 : vector<8x128xf32>
    %c0_9 = arith.constant 0 : index
    %c0_10 = arith.constant 0 : index
    %13 = vector.load %arg4[%c0_9, %c0_10] : memref<8x128xf32, #tpu.memory_space<vmem>>, vector<8x128xf32>
    tpu.vector_store %arg4[%c0_9, %c0_10], %12 {strides = array<i32>} : memref<8x128xf32, #tpu.memory_space<vmem>>, vector<8x128xf32>,
    return
  }
  func.func @transform_0(%arg0: i32) -> (i32, i32) {
    %c0_i32 = arith.constant 0 : i32
    %c0_i32_0 = arith.constant 0 : i32
    return %arg0, %c0_i32 : i32, i32
  }
  func.func @transform_1(%arg0: i32) -> (i32, i32) {
    %c0_i32 = arith.constant 0 : i32
    %c0_i32_0 = arith.constant 0 : i32
    %c0_i32_1 = arith.constant 0 : i32
    return %c0_i32, %c0_i32_0 : i32, i32
  }
  func.func @transform_2(%arg0: i32) -> (i32, i32) {
    %c0_i32 = arith.constant 0 : i32
    %c0_i32_0 = arith.constant 0 : i32
    %c0_i32_1 = arith.constant 0 : i32
    return %c0_i32, %c0_i32_0 : i32, i32
  }
  func.func @transform_3(%arg0: i32) -> (i32, i32) {
    %c0_i32 = arith.constant 0 : i32
    %c0_i32_0 = arith.constant 0 : i32
    return %arg0, %c0_i32 : i32, i32
  }
}

</mosaic_0001>

<bundles_post_ra>
// kernel: _actor_critic_call.1
= control target key start
LH: loop header
LB: loop body
LE: loop exit
PB: predicated region body
PF: predicated region fallthrough
CT: control target
= control target key end

     0   :  { %8 = vsyncpa [#allocation3], 0  ;;  %s431_s0 = inlined_call_operand.hbm [shape: f32[8,8], index: 0, kind: input, shape index: {}]   ;;  %s432_s1 = inlined_call_operand.hbm [shape: f32[9,64], index: 1, kind: input, shape index: {}]   ;;  %s433_s2 = inlined_call_operand.hbm [shape: f32[65,128], index: 2, kind: input, shape index: {}]   ;;  %s434_s3 = inlined_call_operand.vmem [shape: f32[8,128], index: 3, kind: output, shape index: {}]  }
   0x1   :  { %9 = vsyncpa [#allocation5], 0  ;;  %s358_s12 = smov [#allocation4]   ;;  %s288_s16 = scalar_lea.hbm %s432_s1, 256 }
   0x2   :  { %s25_s13 = sshll.u32 %s358_s12, 4  ;;  %p289_p0 = scmp.ne.s32.totalorder %s432_s1, %s288_s16  ;;  %s26_s13 = int_to_ptr.vmem [resolvable:$true] %s25_s13 }
   0x3   :  { %p292_p1 = scmp.lt.u32.totalorder %s288_s16, %s432_s1 }
   0x5   :  { %p294_p2 = pnand %p292_p1, %p289_p0 }
   0x7   :  { %297 = shalt.err (!%p294_p2)
}
   0x8   :  { %s298_s21 = scalar_lea.vmem %s26_s13, 256  ;;  %p303_p4 = scmp.lt.s32.totalorder %s26_s13, %s26_s13 }
   0x9   :  { %p299_p3 = scmp.ne.s32.totalorder %s26_s13, %s298_s21  ;;  %p304_p5 = scmp.lt.s32.totalorder %s298_s21, %s298_s21 }
   0xb   :  { %p305_p6 = por %p304_p5, %p303_p4 }
   0xd   :  { %p306_p7 = pnand %p305_p6, %p299_p3 }
   0xf   :  { %309 = shalt.err (!%p306_p7)
}
  0x10   :  { %s359_s22 = smov 128   ;;  %s360_s23 = smov 8  }
  0x11   :  { %31 = dma.hbm_to_vmem [thread:$0]  %s432_s1, 256, %s26_s13, [#allocation5], %s359_s22, %s359_s22, %s360_s23  }
  0x12   :  { %s361_s26 = smov [#allocation2]   ;;  %s362_s28 = smov [#allocation6]  }
  0x13   :  { %s16_s27 = sshll.u32 %s361_s26, 4  ;;  %s37_s29 = sshll.u32 %s362_s28, 4  ;;  %s17_s27 = int_to_ptr.vmem [resolvable:$true] %s16_s27  ;;  %s38_s29 = int_to_ptr.vmem [resolvable:$true] %s37_s29 }
  0x14   :  { %s310_s5 = scalar_lea.hbm %s431_s0, 128 }
  0x15   :  { %p311_p8 = scmp.ne.s32.totalorder %s431_s0, %s310_s5  ;;  %p314_p9 = scmp.lt.u32.totalorder %s310_s5, %s431_s0 }
  0x17   :  { %p316_p10 = pnand %p314_p9, %p311_p8 }
  0x19   :  { %319 = shalt.err (!%p316_p10)
}
  0x1a   :  { %s320_s1 = scalar_lea.vmem %s17_s27, 128  ;;  %p325_p12 = scmp.lt.s32.totalorder %s17_s27, %s17_s27 }
  0x1b   :  { %p321_p11 = scmp.ne.s32.totalorder %s17_s27, %s320_s1  ;;  %p326_p13 = scmp.lt.s32.totalorder %s320_s1, %s320_s1 }
  0x1d   :  { %p327_p0 = por %p326_p13, %p325_p12 }
  0x1f   :  { %p328_p1 = pnand %p327_p0, %p321_p11 }
  0x21   :  { %331 = shalt.err (!%p328_p1)
}
  0x22   :  { %19 = dma.hbm_to_vmem [thread:$0]  %s431_s0, 128, %s17_s27, [#allocation3]  }
  0x23   :  { %s332_s14 = scalar_lea.hbm %s433_s2, 1152 }
  0x24   :  { %p333_p2 = scmp.ne.s32.totalorder %s433_s2, %s332_s14  ;;  %p336_p3 = scmp.lt.u32.totalorder %s332_s14, %s433_s2 }
  0x26   :  { %p338_p4 = pnand %p336_p3, %p333_p2 }
  0x28   :  { %341 = shalt.err (!%p338_p4)
}
  0x29   :  { %s342_s19 = scalar_lea.vmem %s38_s29, 1152  ;;  %p347_p6 = scmp.lt.s32.totalorder %s38_s29, %s38_s29 }
  0x2a   :  { %p343_p5 = scmp.ne.s32.totalorder %s38_s29, %s342_s19  ;;  %p348_p7 = scmp.lt.s32.totalorder %s342_s19, %s342_s19 }
  0x2c   :  { %p349_p8 = por %p348_p7, %p347_p6 }
  0x2e   :  { %p350_p9 = pnand %p349_p8, %p343_p5 }
  0x30   :  { %353 = shalt.err (!%p350_p9)
}
  0x31   :  { %43 = dma.hbm_to_vmem [thread:$0]  %s433_s2, 1152, %s38_s29, [#allocation5], %s359_s22, %s359_s22, %s360_s23  }
  0x32   :  { %354 = dma.done.wait [#allocation3], 128  }
  0x33   :  { %355 = vsyncadd [#allocation3], 4294967168 }
  0x34   :  { %356 = dma.done.wait [#allocation5], 1408  }
  0x35   :  { %357 = vsyncadd [#allocation5], 4294965888  ;;  %v363_v0 = vmov 0.0   ;;  %vm364_vm0 = vmmov 0   ;;  %v365_v1 = vmov 0.0|0.0   ;;  %vm60_vm1 = vcmask 64512  }
  0x36   :  { %244 = vmatprep.subr.mxu0 %v363_v0  ;;  %246 = vmatprep.mubr.msk.f32.mxu0 %vm364_vm0, %v363_v0  ;;  %v54_v2 = vld [vmem:[#allocation4] sm:$0xff]  ;;  %v53_v3 = vld [vmem:[#allocation2] sm:$0xff]  ;;  %v135_v4 = vld [vmem:[#allocation6] sm:$0xff]  ;;  %vm148_vm2 = vcmask 523264  }
  0x37   :  { %268 = vmatprep.subr.bf16.mxu1 %v365_v1  ;;  %265 = vmatprep.mubr.msk.f32.mxu1 %vm364_vm0, %v363_v0  ;;  %v136_v5 = vld [vmem:[#allocation6 + $0x8] sm:$0xff]  ;;  %v137_v6 = vld [vmem:[#allocation6 + $0x10] sm:$0xff]  ;;  %v138_v7 = vld [vmem:[#allocation6 + $0x18] sm:$0xff] }
  0x38   :  { %245 = vmatpush3.msra.mxu0 %v54_v2  ;;  %v269_v8 = vpack.c.bf16 %v136_v5, %v135_v4  ;;  %v272_v9 = vpack.c.bf16 %v138_v7, %v137_v6  ;;  %v139_v10 = vld [vmem:[#allocation6 + $0x20] sm:$0xff]  ;;  %v140_v11 = vld [vmem:[#allocation6 + $0x28] sm:$0xff]  ;;  %v141_v13 = vld [vmem:[#allocation6 + $0x30] sm:$0xff] }
  0x39   :  { %247 = vmatmul.mubr.msk.f32.vlgmr.msra.gmra.mrb[0].mxu0 %vm60_vm1, %v53_v3  ;;  %v275_v12 = vpack.c.bf16 %v140_v11, %v139_v10  ;;  %v142_v14 = vld [vmem:[#allocation6 + $0x38] sm:$0xff]  ;;  %v231_v21 = vld [vmem:[#allocation6 + $0x40] ss:$0 sm:$0xff] }
  0x3a   :  { %270 = vmatpush3.bf16.msra.mxu1 %v269_v8  ;;  %v278_v15 = vpack.c.bf16 %v142_v14, %v141_v13  ;;  %v229_v16 = vld [vmem:[#allocation4 + $0x8] ss:$0 sm:$0xff] }
  0x3b   :  { %271 = vmatprep.subr.bf16.mxu1 %v365_v1 }
  0x3e   :  { %273 = vmatpush3.bf16.msra.mxu1 %v272_v9 }
  0x3f   :  { %274 = vmatprep.subr.bf16.mxu1 %v365_v1 }
  0x42   :  { %276 = vmatpush3.bf16.msra.mxu1 %v275_v12 }
  0x43   :  { %277 = vmatprep.subr.bf16.mxu1 %v365_v1 }
  0x46   :  { %279 = vmatpush3.bf16.msra.mxu1 %v278_v15 }
 0x10c   :  { %v130_v17 = vpop.f32.mrb[0].mxu0 }
 0x10d   :  { %v131_v18 = vadd.f32 %v229_v16, %v130_v17  ;;  %v248_v19 = vpop.f32.mrb[1].mxu0 }
 0x10f   :  { %v134_v20 = vmax.f32 %v131_v18, 0.0 }
 0x111   :  { %266 = vmatmul.mubr.msk.f32.vlgmr.msra.gmra.mrb[0].mxu1 %vm148_vm2, %v134_v20 }
 0x1e4   :  { %v218_v22 = vpop.f32.mrb[0].mxu1 }
 0x1e5   :  { %v219_v23 = vadd.f32 %v231_v21, %v218_v22  ;;  %v267_v24 = vpop.f32.mrb[1].mxu1 }
 0x1e7   :  { %222 = vst [vmem:[%s434_s3] sm:$0xff] %v219_v23 }
 0x1e8   :  { %227 = vsyncpa [#allocation3], 1 }
 0x1e9   :  { %228 = vsyncpa [#allocation5], 1 }

</bundles_post_ra>
